<compile_context>
chip_gen: v5e
topology: v5e:2x2
jax: 0.10.0
libtpu: 0.0.40
codegen_flags: <defaults>
</compile_context>

<pallas_src>
import functools

import numpy as np
import jax
import jax.numpy as jnp
from jax.experimental import pallas as pl
from jax.experimental.pallas import tpu as pltpu

NEG_SLOPE = 0.01  # nn.LeakyReLU default


def _leaky(t):
    return jnp.where(t > 0, t, NEG_SLOPE * t)


def _round_up(n, m):
    return ((n + m - 1) // m) * m


# ---------------------------------------------------------------------------
# ComparisonBlock kernel: each row (one flattened (nrows, ncols) image of one
# (batch, channel) pair) goes through L x (Linear(dim, dim) + LeakyReLU).
# ---------------------------------------------------------------------------
def _comparison_block_kernel(x_ref, w_ref, b_ref, out_ref, *, extra_leaky):
    # x_ref: (bn, dim) f32 | w_ref: (L, dim, dim) bf16 | b_ref: (L, 1, dim) f32
    t = x_ref[...]
    num_layers = w_ref.shape[0]
    for l in range(num_layers):  # static unroll (L = 4)
        acc = jnp.dot(t.astype(jnp.bfloat16), w_ref[l],
                      preferred_element_type=jnp.float32)   # bf16 MXU, f32 acc
        t = _leaky(acc + b_ref[l])        # bias + LeakyReLU in f32 (v5e-friendly)
    if extra_leaky:                       # the nn.LeakyReLU that follows the block
        t = _leaky(t)
    out_ref[...] = t


def comparison_block(x_rows, w_stack, b_stack, *, extra_leaky=False, bn_max=256):
    """Apply L x (Linear(dim, dim) + LeakyReLU) to every row of x_rows."""
    n, dim = x_rows.shape
    num_layers = w_stack.shape[0]
    assert dim % 128 == 0, "dim must be lane aligned (nrows*ncols multiple of 128)"

    # Row tiling: fill the MXU when B*C is large, pad to the sublane multiple.
    bn = min(_round_up(n, 8), bn_max)
    n_pad = _round_up(n, bn)
    if n_pad != n:
        x_rows = jnp.pad(x_rows, ((0, n_pad - n), (0, 0)))

    w_bf16 = w_stack.astype(jnp.bfloat16)                 # halves weight DMA/VMEM
    b_f32 = b_stack.astype(jnp.float32).reshape(num_layers, 1, dim)

    kernel = functools.partial(_comparison_block_kernel, extra_leaky=extra_leaky)
    out = pl.pallas_call(
        kernel,
        out_shape=jax.ShapeDtypeStruct((n_pad, dim), jnp.float32),
        grid=(n_pad // bn,),
        in_specs=[
            pl.BlockSpec((bn, dim), lambda i: (i, 0)),                   # rows
            pl.BlockSpec((num_layers, dim, dim), lambda i: (0, 0, 0)),   # weights
            pl.BlockSpec((num_layers, 1, dim), lambda i: (0, 0, 0)),     # biases
        ],
        out_specs=pl.BlockSpec((bn, dim), lambda i: (i, 0)),
        compiler_params=pltpu.CompilerParams(
            dimension_semantics=("parallel",)),   # rows independent -> megacore
    )(x_rows, w_bf16, b_f32)
    return out[:n]


# ---------------------------------------------------------------------------
# Flatten + final nn.Linear head (output padded to a lane-dense 128-wide slab).
# ---------------------------------------------------------------------------
def _head_kernel(x_ref, w_ref, b_ref, out_ref):
    out_ref[...] = (jnp.dot(x_ref[...].astype(jnp.bfloat16), w_ref[...],
                            preferred_element_type=jnp.float32)
                    + b_ref[...])


def linear_head(x_flat, w, b):
    batch, k = x_flat.shape
    out_features = w.shape[1]
    n_out = _round_up(out_features, 128)    # lane-dense stores
    b_pad = _round_up(batch, 8)             # f32 sublane multiple

    x_p = jnp.pad(x_flat, ((0, b_pad - batch), (0, 0)))
    w_p = jnp.zeros((k, n_out), jnp.float32).at[:, :out_features].set(w)
    b_p = jnp.zeros((1, n_out), jnp.float32).at[0, :out_features].set(b)

    out = pl.pallas_call(
        _head_kernel,
        out_shape=jax.ShapeDtypeStruct((b_pad, n_out), jnp.float32),
        grid=(1,),
        in_specs=[
            pl.BlockSpec((b_pad, k), lambda i: (0, 0)),
            pl.BlockSpec((k, n_out), lambda i: (0, 0)),
            pl.BlockSpec((1, n_out), lambda i: (0, 0)),
        ],
        out_specs=pl.BlockSpec((b_pad, n_out), lambda i: (0, 0)),
        compiler_params=pltpu.CompilerParams(
            dimension_semantics=("arbitrary",)),
    )(x_p, w_p.astype(jnp.bfloat16), b_p)
    return out[:batch, :out_features]


# ---------------------------------------------------------------------------
# Full forward: ComparisonBlock -> LeakyReLU -> Flatten -> Linear(head).
# ---------------------------------------------------------------------------
def linear_150x150_forward(x, params):
    b, c, h, w = x.shape
    rows = x.reshape(b * c, h * w).astype(jnp.float32)   # x.view(B, C, -1)
    rows = comparison_block(rows, params["block_w"], params["block_b"],
                            extra_leaky=True)            # block + outer LeakyReLU
    flat = rows.reshape(b, c * h * w)                    # Flatten: x.view(B, -1)
    return linear_head(flat, params["head_w"], params["head_b"])


def init_params(key, dim, num_layers, head_in, out_channels):
    # Weights stored as right-multiply matrices (transpose of PyTorch's (out, in)).
    ks = jax.random.split(key, 2 * num_layers + 2)
    block_w = jnp.stack([
        jax.random.normal(ks[i], (dim, dim), jnp.float32) / jnp.sqrt(dim)
        for i in range(num_layers)])
    block_b = jnp.stack([
        0.01 * jax.random.normal(ks[num_layers + i], (dim,), jnp.float32)
        for i in range(num_layers)])
    head_w = (jax.random.normal(ks[-2], (head_in, out_channels), jnp.float32)
              / jnp.sqrt(head_in))
    head_b = 0.01 * jax.random.normal(ks[-1], (out_channels,), jnp.float32)
    return dict(block_w=block_w, block_b=block_b, head_w=head_w, head_b=head_b)


def reference_forward(x, params, cast_dtype=jnp.float32):
    """Pure-JAX reference.  cast_dtype=bf16 mirrors the kernel's precision
    policy exactly; cast_dtype=f32 is the full-precision module semantics."""
    b, c, h, w = x.shape
    t = x.reshape(b * c, h * w).astype(jnp.float32)
    for l in range(params["block_w"].shape[0]):
        wl = params["block_w"][l].astype(cast_dtype)
        y = jnp.dot(t.astype(cast_dtype), wl, preferred_element_type=jnp.float32)
        t = _leaky(y + params["block_b"][l][None, :])
    t = _leaky(t)                                   # the nn.LeakyReLU after the block
    flat = t.reshape(b, c * h * w)                  # Flatten
    wh = params["head_w"].astype(cast_dtype)
    return (jnp.dot(flat.astype(cast_dtype), wh,
                    preferred_element_type=jnp.float32)
            + params["head_b"][None, :])


if __name__ == "__main__":
    B, C, H, W = 2, 4, 16, 16          # small NCHW demo shapes
    OUT_CHANNELS = 10
    NUM_LAYERS = 4                     # ComparisonBlock has 4 x (Linear, LeakyReLU)
    dim = H * W                        # 256

    key = jax.random.PRNGKey(0)
    kx, kp = jax.random.split(key)
    x = jax.random.normal(kx, (B, C, H, W), dtype=jnp.float32)
    params = init_params(kp, dim, NUM_LAYERS, C * dim, OUT_CHANNELS)

    out = jax.block_until_ready(linear_150x150_forward(x, params))
    assert out.shape == (B, OUT_CHANNELS)

    # 1) Kernel exactness under the bf16-weight / f32-accumulate policy.
    ref_bf16 = jax.block_until_ready(
        reference_forward(x, params, cast_dtype=jnp.bfloat16))
    np.testing.assert_allclose(np.asarray(out), np.asarray(ref_bf16),
                               rtol=1e-3, atol=1e-3)

    # 2) Closeness to the full-f32 module semantics (bf16 quantization error;
    #    f32 accumulation keeps it well inside 2e-2 at these sizes).
    ref_f32 = jax.block_until_ready(
        reference_forward(x, params, cast_dtype=jnp.float32))
    np.testing.assert_allclose(np.asarray(out), np.asarray(ref_f32),
                               rtol=2e-2, atol=2e-2)

    print("KERNEL_OK")
</pallas_src>

<mosaic_0001>
module attributes {stable_mosaic.version = 11 : i64} {
  func.func @_comparison_block_kernel(%arg0: i32, %arg1: memref<8x256xf32, #tpu.memory_space<vmem>>, %arg2: memref<4x256x256xbf16, #tpu.memory_space<vmem>>, %arg3: memref<4x1x256xf32, #tpu.memory_space<vmem>>, %arg4: memref<8x256xf32, #tpu.memory_space<vmem>>) attributes {dimension_semantics = [#tpu.dimension_semantics<parallel>], iteration_bounds = array<i64: 1>, scalar_prefetch = 0 : i64, scratch_operands = 0 : i64, tpu.core_type = #tpu.core_type<tc>, window_params = [{transform_indices = @transform_0, window_bounds = array<i64: 8, 256>}, {pipeline_mode = #tpu.pipeline_mode<synchronous>, transform_indices = @transform_1, window_bounds = array<i64: 4, 256, 256>}, {pipeline_mode = #tpu.pipeline_mode<synchronous>, transform_indices = @transform_2, window_bounds = array<i64: 4, 1, 256>}, {transform_indices = @transform_3, window_bounds = array<i64: 8, 256>}]} {
    %c0 = arith.constant 0 : index
    %c0_0 = arith.constant 0 : index
    %0 = vector.load %arg1[%c0, %c0_0] : memref<8x256xf32, #tpu.memory_space<vmem>>, vector<8x256xf32>
    %1 = arith.truncf %0 : vector<8x256xf32> to vector<8x256xbf16>
    %c0_1 = arith.constant 0 : index
    %c0_2 = arith.constant 0 : index
    %c0_3 = arith.constant 0 : index
    %2 = vector.load %arg2[%c0_1, %c0_2, %c0_3] : memref<4x256x256xbf16, #tpu.memory_space<vmem>>, vector<1x256x256xbf16>
    %3 = vector.shape_cast %2 : vector<1x256x256xbf16> to vector<256x256xbf16>
    %cst = arith.constant dense<0.000000e+00> : vector<8x256xf32>
    %4 = tpu.matmul %1, %3, %cst {dimension_numbers = #tpu.dot_dimension_numbers<[1], [0], [0], [1], [0, 0, 1, 1], [], []>} : vector<8x256xbf16>, vector<256x256xbf16>, vector<8x256xf32> -> vector<8x256xf32>
    %c0_4 = arith.constant 0 : index
    %c0_5 = arith.constant 0 : index
    %c0_6 = arith.constant 0 : index
    %5 = vector.load %arg3[%c0_4, %c0_5, %c0_6] : memref<4x1x256xf32, #tpu.memory_space<vmem>>, vector<1x1x256xf32>
    %6 = vector.shape_cast %5 : vector<1x1x256xf32> to vector<1x256xf32>
    %7 = vector.broadcast %6 : vector<1x256xf32> to vector<8x256xf32>
    %8 = arith.addf %4, %7 : vector<8x256xf32>
    %cst_7 = arith.constant 0.000000e+00 : f32
    %9 = vector.broadcast %cst_7 : f32 to vector<8x256xf32>
    %10 = arith.cmpf ogt, %8, %9 : vector<8x256xf32>
    %cst_8 = arith.constant 0.00999999977 : f32
    %11 = vector.broadcast %cst_8 : f32 to vector<8x256xf32>
    %12 = arith.mulf %11, %8 : vector<8x256xf32>
    %13 = arith.select %10, %8, %12 : vector<8x256xi1>, vector<8x256xf32>
    %14 = arith.truncf %13 : vector<8x256xf32> to vector<8x256xbf16>
    %c1 = arith.constant 1 : index
    %c0_9 = arith.constant 0 : index
    %c0_10 = arith.constant 0 : index
    %15 = vector.load %arg2[%c1, %c0_9, %c0_10] : memref<4x256x256xbf16, #tpu.memory_space<vmem>>, vector<1x256x256xbf16>
    %16 = vector.shape_cast %15 : vector<1x256x256xbf16> to vector<256x256xbf16>
    %cst_11 = arith.constant dense<0.000000e+00> : vector<8x256xf32>
    %17 = tpu.matmul %14, %16, %cst_11 {dimension_numbers = #tpu.dot_dimension_numbers<[1], [0], [0], [1], [0, 0, 1, 1], [], []>} : vector<8x256xbf16>, vector<256x256xbf16>, vector<8x256xf32> -> vector<8x256xf32>
    %c1_12 = arith.constant 1 : index
    %c0_13 = arith.constant 0 : index
    %c0_14 = arith.constant 0 : index
    %18 = vector.load %arg3[%c1_12, %c0_13, %c0_14] : memref<4x1x256xf32, #tpu.memory_space<vmem>>, vector<1x1x256xf32>
    %19 = vector.shape_cast %18 : vector<1x1x256xf32> to vector<1x256xf32>
    %20 = vector.broadcast %19 : vector<1x256xf32> to vector<8x256xf32>
    %21 = arith.addf %17, %20 : vector<8x256xf32>
    %cst_15 = arith.constant 0.000000e+00 : f32
    %22 = vector.broadcast %cst_15 : f32 to vector<8x256xf32>
    %23 = arith.cmpf ogt, %21, %22 : vector<8x256xf32>
    %cst_16 = arith.constant 0.00999999977 : f32
    %24 = vector.broadcast %cst_16 : f32 to vector<8x256xf32>
    %25 = arith.mulf %24, %21 : vector<8x256xf32>
    %26 = arith.select %23, %21, %25 : vector<8x256xi1>, vector<8x256xf32>
    %27 = arith.truncf %26 : vector<8x256xf32> to vector<8x256xbf16>
    %c2 = arith.constant 2 : index
    %c0_17 = arith.constant 0 : index
    %c0_18 = arith.constant 0 : index
    %28 = vector.load %arg2[%c2, %c0_17, %c0_18] : memref<4x256x256xbf16, #tpu.memory_space<vmem>>, vector<1x256x256xbf16>
    %29 = vector.shape_cast %28 : vector<1x256x256xbf16> to vector<256x256xbf16>
    %cst_19 = arith.constant dense<0.000000e+00> : vector<8x256xf32>
    %30 = tpu.matmul %27, %29, %cst_19 {dimension_numbers = #tpu.dot_dimension_numbers<[1], [0], [0], [1], [0, 0, 1, 1], [], []>} : vector<8x256xbf16>, vector<256x256xbf16>, vector<8x256xf32> -> vector<8x256xf32>
    %c2_20 = arith.constant 2 : index
    %c0_21 = arith.constant 0 : index
    %c0_22 = arith.constant 0 : index
    %31 = vector.load %arg3[%c2_20, %c0_21, %c0_22] : memref<4x1x256xf32, #tpu.memory_space<vmem>>, vector<1x1x256xf32>
    %32 = vector.shape_cast %31 : vector<1x1x256xf32> to vector<1x256xf32>
    %33 = vector.broadcast %32 : vector<1x256xf32> to vector<8x256xf32>
    %34 = arith.addf %30, %33 : vector<8x256xf32>
    %cst_23 = arith.constant 0.000000e+00 : f32
    %35 = vector.broadcast %cst_23 : f32 to vector<8x256xf32>
    %36 = arith.cmpf ogt, %34, %35 : vector<8x256xf32>
    %cst_24 = arith.constant 0.00999999977 : f32
    %37 = vector.broadcast %cst_24 : f32 to vector<8x256xf32>
    %38 = arith.mulf %37, %34 : vector<8x256xf32>
    %39 = arith.select %36, %34, %38 : vector<8x256xi1>, vector<8x256xf32>
    %40 = arith.truncf %39 : vector<8x256xf32> to vector<8x256xbf16>
    %c3 = arith.constant 3 : index
    %c0_25 = arith.constant 0 : index
    %c0_26 = arith.constant 0 : index
    %41 = vector.load %arg2[%c3, %c0_25, %c0_26] : memref<4x256x256xbf16, #tpu.memory_space<vmem>>, vector<1x256x256xbf16>
    %42 = vector.shape_cast %41 : vector<1x256x256xbf16> to vector<256x256xbf16>
    %cst_27 = arith.constant dense<0.000000e+00> : vector<8x256xf32>
    %43 = tpu.matmul %40, %42, %cst_27 {dimension_numbers = #tpu.dot_dimension_numbers<[1], [0], [0], [1], [0, 0, 1, 1], [], []>} : vector<8x256xbf16>, vector<256x256xbf16>, vector<8x256xf32> -> vector<8x256xf32>
    %c3_28 = arith.constant 3 : index
    %c0_29 = arith.constant 0 : index
    %c0_30 = arith.constant 0 : index
    %44 = vector.load %arg3[%c3_28, %c0_29, %c0_30] : memref<4x1x256xf32, #tpu.memory_space<vmem>>, vector<1x1x256xf32>
    %45 = vector.shape_cast %44 : vector<1x1x256xf32> to vector<1x256xf32>
    %46 = vector.broadcast %45 : vector<1x256xf32> to vector<8x256xf32>
    %47 = arith.addf %43, %46 : vector<8x256xf32>
    %cst_31 = arith.constant 0.000000e+00 : f32
    %48 = vector.broadcast %cst_31 : f32 to vector<8x256xf32>
    %49 = arith.cmpf ogt, %47, %48 : vector<8x256xf32>
    %cst_32 = arith.constant 0.00999999977 : f32
    %50 = vector.broadcast %cst_32 : f32 to vector<8x256xf32>
    %51 = arith.mulf %50, %47 : vector<8x256xf32>
    %52 = arith.select %49, %47, %51 : vector<8x256xi1>, vector<8x256xf32>
    %cst_33 = arith.constant 0.000000e+00 : f32
    %53 = vector.broadcast %cst_33 : f32 to vector<8x256xf32>
    %54 = arith.cmpf ogt, %52, %53 : vector<8x256xf32>
    %cst_34 = arith.constant 0.00999999977 : f32
    %55 = vector.broadcast %cst_34 : f32 to vector<8x256xf32>
    %56 = arith.mulf %55, %52 : vector<8x256xf32>
    %57 = arith.select %54, %52, %56 : vector<8x256xi1>, vector<8x256xf32>
    %c0_35 = arith.constant 0 : index
    %c0_36 = arith.constant 0 : index
    %58 = vector.load %arg4[%c0_35, %c0_36] : memref<8x256xf32, #tpu.memory_space<vmem>>, vector<8x256xf32>
    tpu.vector_store %arg4[%c0_35, %c0_36], %57 {strides = array<i32>} : memref<8x256xf32, #tpu.memory_space<vmem>>, vector<8x256xf32>,
    return
  }
  func.func @transform_0(%arg0: i32) -> (i32, i32) {
    %c0_i32 = arith.constant 0 : i32
    %c0_i32_0 = arith.constant 0 : i32
    return %arg0, %c0_i32 : i32, i32
  }
  func.func @transform_1(%arg0: i32) -> (i32, i32, i32) {
    %c0_i32 = arith.constant 0 : i32
    %c0_i32_0 = arith.constant 0 : i32
    %c0_i32_1 = arith.constant 0 : i32
    %c0_i32_2 = arith.constant 0 : i32
    return %c0_i32, %c0_i32_0, %c0_i32_1 : i32, i32, i32
  }
  func.func @transform_2(%arg0: i32) -> (i32, i32, i32) {
    %c0_i32 = arith.constant 0 : i32
    %c0_i32_0 = arith.constant 0 : i32
    %c0_i32_1 = arith.constant 0 : i32
    %c0_i32_2 = arith.constant 0 : i32
    return %c0_i32, %c0_i32_0, %c0_i32_1 : i32, i32, i32
  }
  func.func @transform_3(%arg0: i32) -> (i32, i32) {
    %c0_i32 = arith.constant 0 : i32
    %c0_i32_0 = arith.constant 0 : i32
    return %arg0, %c0_i32 : i32, i32
  }
}

</mosaic_0001>

<bundles_post_ra>
// kernel: tpu_custom_call.1
= control target key start
LH: loop header
LB: loop body
LE: loop exit
PB: predicated region body
PF: predicated region fallthrough
CT: control target
= control target key end

     0   :  { %8 = vsyncpa [#allocation3], 0  ;;  %s1916_s0 = inlined_call_operand.hbm [shape: f32[8,256], index: 0, kind: input, shape index: {}]   ;;  %s1917_s1 = inlined_call_operand.hbm [shape: bf16[4,256,256], index: 1, kind: input, shape index: {}]   ;;  %s1918_s2 = inlined_call_operand.hbm [shape: f32[4,1,256], index: 2, kind: input, shape index: {}]   ;;  %s1919_s3 = inlined_call_operand.hbm [shape: f32[8,256], index: 3, kind: output, shape index: {}]  }
   0x1   :  { %9 = vsyncpa [#allocation6], 0  ;;  %s26_s14 = sshll.u32 %s1917_s1, 4  ;;  %s27_s14 = int_to_ptr.hbm [resolvable:$true] %s26_s14 }
   0x2   :  { %10 = vsyncpa [#allocation4], 0  ;;  %s1876_s15 = smov [#allocation5]   ;;  %s16_s19 = sshll.u32 %s1916_s0, 4  ;;  %s17_s19 = int_to_ptr.hbm [resolvable:$true] %s16_s19 }
   0x3   :  { %s28_s16 = sshll.u32 %s1876_s15, 4  ;;  %s1877_s20 = smov 128   ;;  %s29_s16 = int_to_ptr.vmem [resolvable:$true] %s28_s16 }
   0x4   :  { %s1878_s21 = smov 8   ;;  %s1879_s22 = smov [#allocation2]  }
   0x5   :  { %34 = dma.hbm_to_vmem [thread:$0]  %s27_s14, 16384, %s29_s16, [#allocation6], %s1877_s20, %s1877_s20, %s1878_s21  }
   0x6   :  { %s18_s23 = sshll.u32 %s1879_s22, 4  ;;  %s39_s26 = sshll.u32 %s1918_s2, 4  ;;  %s19_s23 = int_to_ptr.vmem [resolvable:$true] %s18_s23  ;;  %s40_s26 = int_to_ptr.hbm [resolvable:$true] %s39_s26 }
   0x7   :  { %21 = dma.hbm_to_vmem [thread:$0]  %s17_s19, 256, %s19_s23, [#allocation3]  }
   0x8   :  { %s1880_s1 = smov [#allocation7]   ;;  %s1881_s28 = smov 32  }
   0x9   :  { %s41_s27 = sshll.u32 %s1880_s1, 4  ;;  %s1882_s29 = smov 2   ;;  %s42_s27 = int_to_ptr.vmem [resolvable:$true] %s41_s27 }
   0xa   :  { %47 = dma.hbm_to_vmem [thread:$0]  %s40_s26, 128, %s42_s27, [#allocation6], %s1881_s28, %s1881_s28, %s1882_s29  }
   0xb   :  { %1870 = dma.done.wait [#allocation3], 256  }
   0xc   :  { %1871 = vsyncadd [#allocation3], 4294967040 }
   0xd   :  { %1872 = dma.done.wait [#allocation6], 16512  }
   0xe   :  { %1873 = vsyncadd [#allocation6], 4294950784  ;;  %v1184_v0 = vld [vmem:[#allocation5 + $0x70] sm:$0xf]  ;;  %v1653_v1 = vld [vmem:[#allocation5 + $0x74] sm:$0xf0] }
   0xf   :  { %v1248_v2 = vld [vmem:[#allocation5 + $0xf0] sm:$0xf]  ;;  %v1185_v3 = vor.u32 %v1653_v1, %v1184_v0  ;;  %v1669_v4 = vld [vmem:[#allocation5 + $0xf4] sm:$0xf0]  ;;  %v1652_v5 = vld [vmem:[#allocation5 + $0x74] sm:$0xf] }
  0x10   :  { %v1186_v6 = vld [vmem:[#allocation5 + $0x78] sm:$0xf0]  ;;  %v1249_v7 = vor.u32 %v1669_v4, %v1248_v2  ;;  %v1668_v9 = vld [vmem:[#allocation5 + $0xf4] sm:$0xf]  ;;  %v1176_v11 = vld [vmem:[#allocation5 + $0x60] sm:$0xf] }
  0x11   :  { %v1189_v8 = vor.u32 %v1652_v5, %v1186_v6  ;;  %v1250_v10 = vld [vmem:[#allocation5 + $0xf8] sm:$0xf0]  ;;  %262 = vmatpush.bf16.msra.mxu0 %v1185_v3  ;;  %v1651_v13 = vld [vmem:[#allocation5 + $0x64] sm:$0xf0]  ;;  %v1240_v14 = vld [vmem:[#allocation5 + $0xe0] sm:$0xf] }
  0x12   :  { %v1253_v12 = vor.u32 %v1668_v9, %v1250_v10  ;;  %v1667_v15 = vld [vmem:[#allocation5 + $0xe4] sm:$0xf0]  ;;  %275 = vmatpush.bf16.msra.mxu1 %v1249_v7  ;;  %v1177_v16 = vor.u32 %v1651_v13, %v1176_v11  ;;  %v1650_v18 = vld [vmem:[#allocation5 + $0x64] sm:$0xf]  ;;  %v1178_v19 = vld [vmem:[#allocation5 + $0x68] sm:$0xf0] }
  0x13   :  { %288 = vmatpush.bf16.msra.mxu2 %v1189_v8  ;;  %v1241_v17 = vor.u32 %v1667_v15, %v1240_v14  ;;  %v1666_v20 = vld [vmem:[#allocation5 + $0xe4] sm:$0xf]  ;;  %v1181_v21 = vor.u32 %v1650_v18, %v1178_v19  ;;  %v1242_v22 = vld [vmem:[#allocation5 + $0xe8] sm:$0xf0]  ;;  %v1168_v23 = vld [vmem:[#allocation5 + $0x50] sm:$0xf] }
  0x14   :  { %301 = vmatpush.bf16.msra.mxu3 %v1253_v12  ;;  %v1649_v24 = vld [vmem:[#allocation5 + $0x54] sm:$0xf0]  ;;  %v1245_v25 = vor.u32 %v1666_v20, %v1242_v22  ;;  %v1232_v26 = vld [vmem:[#allocation5 + $0xd0] sm:$0xf]  ;;  %v1648_v28 = vld [vmem:[#allocation5 + $0x54] sm:$0xf] }
  0x15   :  { %v1665_v27 = vld [vmem:[#allocation5 + $0xd4] sm:$0xf0]  ;;  %263 = vmatpush.bf16.msra.mxu0 %v1177_v16  ;;  %v1169_v29 = vor.u32 %v1649_v24, %v1168_v23  ;;  %v1170_v30 = vld [vmem:[#allocation5 + $0x58] sm:$0xf0]  ;;  %v1664_v31 = vld [vmem:[#allocation5 + $0xd4] sm:$0xf] }
  0x16   :  { %v1234_v32 = vld [vmem:[#allocation5 + $0xd8] sm:$0xf0]  ;;  %276 = vmatpush.bf16.msra.mxu1 %v1241_v17  ;;  %v1233_v33 = vor.u32 %v1665_v27, %v1232_v26  ;;  %v1173_v34 = vor.u32 %v1648_v28, %v1170_v30  ;;  %v1160_v35 = vld [vmem:[#allocation5 + $0x40] sm:$0xf]  ;;  %v1647_v36 = vld [vmem:[#allocation5 + $0x44] sm:$0xf0] }
  0x17   :  { %289 = vmatpush.bf16.msra.mxu2 %v1181_v21  ;;  %v1224_v37 = vld [vmem:[#allocation5 + $0xc0] sm:$0xf]  ;;  %v1237_v38 = vor.u32 %v1664_v31, %v1234_v32  ;;  %v1663_v39 = vld [vmem:[#allocation5 + $0xc4] sm:$0xf0]  ;;  %v1646_v40 = vld [vmem:[#allocation5 + $0x44] sm:$0xf]  ;;  %v1161_v44 = vor.u32 %v1647_v36, %v1160_v35 }
  0x18   :  { %302 = vmatpush.bf16.msra.mxu3 %v1245_v25  ;;  %v1162_v41 = vld [vmem:[#allocation5 + $0x48] sm:$0xf0]  ;;  %v1662_v42 = vld [vmem:[#allocation5 + $0xc4] sm:$0xf]  ;;  %v1225_v45 = vor.u32 %v1663_v39, %v1224_v37  ;;  %v1152_v47 = vld [vmem:[#allocation5 + $0x30] sm:$0xf] }
  0x19   :  { %v1226_v43 = vld [vmem:[#allocation5 + $0xc8] sm:$0xf0]  ;;  %264 = vmatpush.bf16.msra.mxu0 %v1169_v29  ;;  %v1165_v46 = vor.u32 %v1646_v40, %v1162_v41  ;;  %v1645_v48 = vld [vmem:[#allocation5 + $0x34] sm:$0xf0]  ;;  %v1216_v49 = vld [vmem:[#allocation5 + $0xb0] sm:$0xf] }
  0x1a   :  { %277 = vmatpush.bf16.msra.mxu1 %v1233_v33  ;;  %v1229_v50 = vor.u32 %v1662_v42, %v1226_v43  ;;  %v1661_v51 = vld [vmem:[#allocation5 + $0xb4] sm:$0xf0]  ;;  %v1644_v52 = vld [vmem:[#allocation5 + $0x34] sm:$0xf]  ;;  %v1154_v53 = vld [vmem:[#allocation5 + $0x38] sm:$0xf0]  ;;  %v1153_v56 = vor.u32 %v1645_v48, %v1152_v47 }
  0x1b   :  { %290 = vmatpush.bf16.msra.mxu2 %v1173_v34  ;;  %v1660_v54 = vld [vmem:[#allocation5 + $0xb4] sm:$0xf]  ;;  %v1218_v55 = vld [vmem:[#allocation5 + $0xb8] sm:$0xf0]  ;;  %v1217_v57 = vor.u32 %v1661_v51, %v1216_v49  ;;  %v1157_v58 = vor.u32 %v1644_v52, %v1154_v53  ;;  %v1144_v59 = vld [vmem:[#allocation5 + $0x20] sm:$0xf] }
  0x1c   :  { %303 = vmatpush.bf16.msra.mxu3 %v1237_v38  ;;  %v1643_v60 = vld [vmem:[#allocation5 + $0x24] sm:$0xf0]  ;;  %v1208_v61 = vld [vmem:[#allocation5 + $0xa0] sm:$0xf]  ;;  %v1221_v62 = vor.u32 %v1660_v54, %v1218_v55  ;;  %v1642_v0 = vld [vmem:[#allocation5 + $0x24] sm:$0xf] }
  0x1d   :  { %265 = vmatpush.bf16.msra.mxu0 %v1161_v44  ;;  %v1659_v63 = vld [vmem:[#allocation5 + $0xa4] sm:$0xf0]  ;;  %v1146_v1 = vld [vmem:[#allocation5 + $0x28] sm:$0xf0]  ;;  %v1658_v2 = vld [vmem:[#allocation5 + $0xa4] sm:$0xf]  ;;  %v1145_v4 = vor.u32 %v1643_v60, %v1144_v59 }
  0x1e   :  { %278 = vmatpush.bf16.msra.mxu1 %v1225_v45  ;;  %v1210_v3 = vld [vmem:[#allocation5 + $0xa8] sm:$0xf0]  ;;  %v1209_v5 = vor.u32 %v1659_v63, %v1208_v61  ;;  %v1149_v6 = vor.u32 %v1642_v0, %v1146_v1  ;;  %v1136_v7 = vld [vmem:[#allocation5 + $0x10] sm:$0xf]  ;;  %v1641_v8 = vld [vmem:[#allocation5 + $0x14] sm:$0xf0] }
  0x1f   :  { %291 = vmatpush.bf16.msra.mxu2 %v1165_v46  ;;  %v1200_v9 = vld [vmem:[#allocation5 + $0x90] sm:$0xf]  ;;  %v1213_v10 = vor.u32 %v1658_v2, %v1210_v3  ;;  %v1657_v11 = vld [vmem:[#allocation5 + $0x94] sm:$0xf0]  ;;  %v1640_v12 = vld [vmem:[#allocation5 + $0x14] sm:$0xf]  ;;  %v1137_v16 = vor.u32 %v1641_v8, %v1136_v7 }
  0x20   :  { %304 = vmatpush.bf16.msra.mxu3 %v1229_v50  ;;  %v1138_v13 = vld [vmem:[#allocation5 + $0x18] sm:$0xf0]  ;;  %v1656_v14 = vld [vmem:[#allocation5 + $0x94] sm:$0xf]  ;;  %v1128_v17 = vld [vmem:[#allocation5] sm:$0xf]  ;;  %v1201_v18 = vor.u32 %v1657_v11, %v1200_v9 }
  0x21   :  { %266 = vmatpush.bf16.msra.mxu0 %v1153_v56  ;;  %v1202_v15 = vld [vmem:[#allocation5 + $0x98] sm:$0xf0]  ;;  %v1141_v19 = vor.u32 %v1640_v12, %v1138_v13  ;;  %v1639_v20 = vld [vmem:[#allocation5 + $0x4] sm:$0xf0]  ;;  %v1192_v21 = vld [vmem:[#allocation5 + $0x80] sm:$0xf] }
  0x22   :  { %279 = vmatpush.bf16.msra.mxu1 %v1217_v57  ;;  %v1655_v22 = vld [vmem:[#allocation5 + $0x84] sm:$0xf0]  ;;  %v1205_v23 = vor.u32 %v1656_v14, %v1202_v15  ;;  %v1638_v24 = vld [vmem:[#allocation5 + $0x4] sm:$0xf]  ;;  %v1130_v25 = vld [vmem:[#allocation5 + $0x8] sm:$0xf0]  ;;  %v1129_v30 = vor.u32 %v1639_v20, %v1128_v17 }
  0x23   :  { %292 = vmatpush.bf16.msra.mxu2 %v1157_v58  ;;  %v1654_v26 = vld [vmem:[#allocation5 + $0x84] sm:$0xf]  ;;  %v1194_v27 = vld [vmem:[#allocation5 + $0x88] sm:$0xf0]  ;;  %v1312_v28 = vld [vmem:[#allocation5 + $0x170] sm:$0xf]  ;;  %v1193_v34 = vor.u32 %v1655_v22, %v1192_v21  ;;  %v1133_v35 = vor.u32 %v1638_v24, %v1130_v25 }
  0x24   :  { %305 = vmatpush.bf16.msra.mxu3 %v1221_v62  ;;  %v1685_v29 = vld [vmem:[#allocation5 + $0x174] sm:$0xf0]  ;;  %v60_v31 = vld [vmem:[#allocation2] sm:$0xff]  ;;  %v1314_v33 = vld [vmem:[#allocation5 + $0x178] sm:$0xf0]  ;;  %v1197_v37 = vor.u32 %v1654_v26, %v1194_v27  ;;  %s1883_s0 = smov [#allocation8]  }
  0x25   :  { %267 = vmatpush.bf16.msra.mxu0 %v1145_v4  ;;  %v1684_v32 = vld [vmem:[#allocation5 + $0x174] sm:$0xf]  ;;  %v61_v36 = vld [vmem:[#allocation2 + $0x8] sm:$0xff]  ;;  %v1313_v38 = vor.u32 %v1685_v29, %v1312_v28  ;;  %v1304_v39 = vld [vmem:[#allocation5 + $0x160] sm:$0xf]  ;;  %v62_v42 = vpack.c.bf16 %v60_v31, %v60_v31  ;;  %s1113_s2 = sshll.u32 %s1883_s0, 4  ;;  %s1114_s2 = int_to_ptr.vmem [resolvable:$true] %s1113_s2 }
  0x26   :  { %280 = vmatpush.bf16.msra.mxu1 %v1209_v5  ;;  %v1376_v40 = vld [vmem:[#allocation5 + $0x1f0] sm:$0xf]  ;;  %v1701_v41 = vld [vmem:[#allocation5 + $0x1f4] sm:$0xf0]  ;;  %v1317_v43 = vor.u32 %v1684_v32, %v1314_v33  ;;  %v1683_v44 = vld [vmem:[#allocation5 + $0x164] sm:$0xf0]  ;;  %v63_v47 = vpack.c.bf16 %v61_v36, %v61_v36 }
  0x27   :  { %293 = vmatpush.bf16.msra.mxu2 %v1149_v6  ;;  %v1700_v45 = vld [vmem:[#allocation5 + $0x1f4] sm:$0xf]  ;;  %v1378_v46 = vld [vmem:[#allocation5 + $0x1f8] sm:$0xf0]  ;;  %v1682_v48 = vld [vmem:[#allocation5 + $0x164] sm:$0xf]  ;;  %v1377_v50 = vor.u32 %v1701_v41, %v1376_v40  ;;  %v1305_v51 = vor.u32 %v1683_v44, %v1304_v39 }
  0x28   :  { %306 = vmatpush.bf16.msra.mxu3 %v1213_v10  ;;  %v1306_v49 = vld [vmem:[#allocation5 + $0x168] sm:$0xf0]  ;;  %v1381_v52 = vor.u32 %v1700_v45, %v1378_v46  ;;  %v1296_v53 = vld [vmem:[#allocation5 + $0x150] sm:$0xf]  ;;  %v1368_v54 = vld [vmem:[#allocation5 + $0x1e0] sm:$0xf] }
  0x29   :  { %268 = vmatpush.bf16.msra.mxu0 %v1137_v16  ;;  %v1699_v55 = vld [vmem:[#allocation5 + $0x1e4] sm:$0xf0]  ;;  %v1309_v56 = vor.u32 %v1682_v48, %v1306_v49  ;;  %v1681_v57 = vld [vmem:[#allocation5 + $0x154] sm:$0xf0]  ;;  %v1698_v58 = vld [vmem:[#allocation5 + $0x1e4] sm:$0xf] }
  0x2a   :  { %281 = vmatpush.bf16.msra.mxu1 %v1201_v18  ;;  %v1370_v59 = vld [vmem:[#allocation5 + $0x1e8] sm:$0xf0]  ;;  %v1680_v60 = vld [vmem:[#allocation5 + $0x154] sm:$0xf]  ;;  %v1298_v61 = vld [vmem:[#allocation5 + $0x158] sm:$0xf0]  ;;  %v1369_v62 = vor.u32 %v1699_v55, %v1368_v54  ;;  %v1297_v63 = vor.u32 %v1681_v57, %v1296_v53 }
  0x2b   :  { %294 = vmatpush.bf16.msra.mxu2 %v1141_v19  ;;  %v1373_v0 = vor.u32 %v1698_v58, %v1370_v59  ;;  %v1288_v1 = vld [vmem:[#allocation5 + $0x140] sm:$0xf]  ;;  %v1360_v2 = vld [vmem:[#allocation5 + $0x1d0] sm:$0xf]  ;;  %v1697_v3 = vld [vmem:[#allocation5 + $0x1d4] sm:$0xf0]  ;;  %v1301_v4 = vor.u32 %v1680_v60, %v1298_v61 }
  0x2c   :  { %307 = vmatpush.bf16.msra.mxu3 %v1205_v23  ;;  %v1679_v5 = vld [vmem:[#allocation5 + $0x144] sm:$0xf0]  ;;  %v1696_v6 = vld [vmem:[#allocation5 + $0x1d4] sm:$0xf]  ;;  %v1362_v7 = vld [vmem:[#allocation5 + $0x1d8] sm:$0xf0]  ;;  %v1361_v10 = vor.u32 %v1697_v3, %v1360_v2 }
  0x2d   :  { %269 = vmatpush.bf16.msra.mxu0 %v1129_v30  ;;  %v1678_v8 = vld [vmem:[#allocation5 + $0x144] sm:$0xf]  ;;  %v1290_v9 = vld [vmem:[#allocation5 + $0x148] sm:$0xf0]  ;;  %v1289_v11 = vor.u32 %v1679_v5, %v1288_v1  ;;  %v1365_v12 = vor.u32 %v1696_v6, %v1362_v7  ;;  %v1280_v13 = vld [vmem:[#allocation5 + $0x130] sm:$0xf] }
  0x2e   :  { %282 = vmatpush.bf16.msra.mxu1 %v1193_v34  ;;  %v1352_v14 = vld [vmem:[#allocation5 + $0x1c0] sm:$0xf]  ;;  %v1695_v15 = vld [vmem:[#allocation5 + $0x1c4] sm:$0xf0]  ;;  %v1293_v16 = vor.u32 %v1678_v8, %v1290_v9  ;;  %v1677_v17 = vld [vmem:[#allocation5 + $0x134] sm:$0xf0] }
  0x2f   :  { %295 = vmatpush.bf16.msra.mxu2 %v1133_v35  ;;  %v1694_v18 = vld [vmem:[#allocation5 + $0x1c4] sm:$0xf]  ;;  %v1354_v19 = vld [vmem:[#allocation5 + $0x1c8] sm:$0xf0]  ;;  %v1676_v20 = vld [vmem:[#allocation5 + $0x134] sm:$0xf]  ;;  %v1353_v22 = vor.u32 %v1695_v15, %v1352_v14  ;;  %v1281_v23 = vor.u32 %v1677_v17, %v1280_v13 }
  0x30   :  { %308 = vmatpush.bf16.msra.mxu3 %v1197_v37  ;;  %270 = vmatmul.bf16.vlgmr.msra.gmra.mxu0 %v62_v42  ;;  %v1282_v21 = vld [vmem:[#allocation5 + $0x138] sm:$0xf0]  ;;  %v1357_v24 = vor.u32 %v1694_v18, %v1354_v19  ;;  %v1272_v26 = vld [vmem:[#allocation5 + $0x120] sm:$0xf]  ;;  %v1675_v27 = vld [vmem:[#allocation5 + $0x124] sm:$0xf0] }
  0x31   :  { %522 = vmatpush.bf16.msrb.mxu0 %v1313_v38  ;;  %283 = vmatmul.bf16.vlgmr.msra.gmra.mxu1 %v63_v47  ;;  %v1285_v25 = vor.u32 %v1676_v20, %v1282_v21  ;;  %v1674_v28 = vld [vmem:[#allocation5 + $0x124] sm:$0xf]  ;;  %v1274_v29 = vld [vmem:[#allocation5 + $0x128] sm:$0xf0]  ;;  %v1273_v30 = vor.u32 %v1675_v27, %v1272_v26  ;;  %v1344_v32 = vld [vmem:[#allocation5 + $0x1b0] sm:$0xf] }
  0x32   :  { %296 = vmatmul.bf16.vlgmr.msra.gmra.mxu2 %v62_v42  ;;  %535 = vmatpush.bf16.msrb.mxu1 %v1377_v50  ;;  %v1277_v31 = vor.u32 %v1674_v28, %v1274_v29  ;;  %v1693_v33 = vld [vmem:[#allocation5 + $0x1b4] sm:$0xf0]  ;;  %v1692_v34 = vld [vmem:[#allocation5 + $0x1b4] sm:$0xf]  ;;  %v1346_v36 = vld [vmem:[#allocation5 + $0x1b8] sm:$0xf0] }
  0x33   :  { %548 = vmatpush.bf16.msrb.mxu2 %v1317_v43  ;;  %309 = vmatmul.bf16.vlgmr.msra.gmra.mxu3 %v63_v47  ;;  %v1345_v35 = vor.u32 %v1693_v33, %v1344_v32  ;;  %v1349_v37 = vor.u32 %v1692_v34, %v1346_v36  ;;  %v1264_v38 = vld [vmem:[#allocation5 + $0x110] sm:$0xf]  ;;  %v1673_v39 = vld [vmem:[#allocation5 + $0x114] sm:$0xf0]  ;;  %v1672_v40 = vld [vmem:[#allocation5 + $0x114] sm:$0xf] }
  0x34   :  { %561 = vmatpush.bf16.msrb.mxu3 %v1381_v52  ;;  %v1265_v41 = vor.u32 %v1673_v39, %v1264_v38  ;;  %v1266_v42 = vld [vmem:[#allocation5 + $0x118] sm:$0xf0]  ;;  %v1336_v44 = vld [vmem:[#allocation5 + $0x1a0] sm:$0xf]  ;;  %v1691_v45 = vld [vmem:[#allocation5 + $0x1a4] sm:$0xf0] }
  0x35   :  { %523 = vmatpush.bf16.msrb.mxu0 %v1305_v51  ;;  %v1269_v43 = vor.u32 %v1672_v40, %v1266_v42  ;;  %v1690_v46 = vld [vmem:[#allocation5 + $0x1a4] sm:$0xf]  ;;  %v1337_v47 = vor.u32 %v1691_v45, %v1336_v44  ;;  %v1338_v48 = vld [vmem:[#allocation5 + $0x1a8] sm:$0xf0]  ;;  %v1256_v50 = vld [vmem:[#allocation5 + $0x100] sm:$0xf] }
  0x36   :  { %536 = vmatpush.bf16.msrb.mxu1 %v1369_v62  ;;  %v1341_v49 = vor.u32 %v1690_v46, %v1338_v48  ;;  %v1671_v51 = vld [vmem:[#allocation5 + $0x104] sm:$0xf0]  ;;  %v1670_v52 = vld [vmem:[#allocation5 + $0x104] sm:$0xf]  ;;  %v1258_v54 = vld [vmem:[#allocation5 + $0x108] sm:$0xf0] }
  0x37   :  { %549 = vmatpush.bf16.msrb.mxu2 %v1309_v56  ;;  %v1257_v53 = vor.u32 %v1671_v51, %v1256_v50  ;;  %v1261_v55 = vor.u32 %v1670_v52, %v1258_v54  ;;  %v1328_v56 = vld [vmem:[#allocation5 + $0x190] sm:$0xf]  ;;  %v1689_v57 = vld [vmem:[#allocation5 + $0x194] sm:$0xf0]  ;;  %v1688_v58 = vld [vmem:[#allocation5 + $0x194] sm:$0xf] }
  0x38   :  { %562 = vmatpush.bf16.msrb.mxu3 %v1373_v0  ;;  %v1329_v59 = vor.u32 %v1689_v57, %v1328_v56  ;;  %v1330_v60 = vld [vmem:[#allocation5 + $0x198] sm:$0xf0]  ;;  %v1320_v62 = vld [vmem:[#allocation5 + $0x180] sm:$0xf]  ;;  %v1686_v0 = vld [vmem:[#allocation5 + $0x184] sm:$0xf] }
  0x39   :  { %524 = vmatpush.bf16.msrb.mxu0 %v1297_v63  ;;  %v1333_v61 = vor.u32 %v1688_v58, %v1330_v60  ;;  %v1687_v63 = vld [vmem:[#allocation5 + $0x184] sm:$0xf0]  ;;  %v1322_v2 = vld [vmem:[#allocation5 + $0x188] sm:$0xf0]  ;;  %v1717_v5 = vld [vmem:[#allocation5 + $0x274] sm:$0xf0] }
  0x3a   :  { %537 = vmatpush.bf16.msrb.mxu1 %v1361_v10  ;;  %v1321_v1 = vor.u32 %v1687_v63, %v1320_v62  ;;  %v1325_v3 = vor.u32 %v1686_v0, %v1322_v2  ;;  %v1716_v6 = vld [vmem:[#allocation5 + $0x274] sm:$0xf]  ;;  %v1442_v8 = vld [vmem:[#allocation5 + $0x278] sm:$0xf0]  ;;  %v1432_v9 = vld [vmem:[#allocation5 + $0x260] sm:$0xf] }
  0x3b   :  { %550 = vmatpush.bf16.msrb.mxu2 %v1301_v4  ;;  %v1440_v4 = vld [vmem:[#allocation5 + $0x270] sm:$0xf]  ;;  %v1715_v10 = vld [vmem:[#allocation5 + $0x264] sm:$0xf0]  ;;  %v1434_v13 = vld [vmem:[#allocation5 + $0x268] sm:$0xf0] }
  0x3c   :  { %563 = vmatpush.bf16.msrb.mxu3 %v1365_v12  ;;  %v1441_v7 = vor.u32 %v1717_v5, %v1440_v4  ;;  %v1714_v12 = vld [vmem:[#allocation5 + $0x264] sm:$0xf]  ;;  %v1504_v14 = vld [vmem:[#allocation5 + $0x2f0] sm:$0xf]  ;;  %v1433_v15 = vor.u32 %v1715_v10, %v1432_v9  ;;  %v1732_v17 = vld [vmem:[#allocation5 + $0x2f4] sm:$0xf] }
  0x3d   :  { %525 = vmatpush.bf16.msrb.mxu0 %v1289_v11  ;;  %v1445_v11 = vor.u32 %v1716_v6, %v1442_v8  ;;  %v1506_v18 = vld [vmem:[#allocation5 + $0x2f8] sm:$0xf0]  ;;  %v1437_v19 = vor.u32 %v1714_v12, %v1434_v13  ;;  %v1496_v26 = vld [vmem:[#allocation5 + $0x2e0] sm:$0xf]  ;;  %v1731_v27 = vld [vmem:[#allocation5 + $0x2e4] sm:$0xf0] }
  0x3e   :  { %538 = vmatpush.bf16.msrb.mxu1 %v1353_v22  ;;  %v1509_v21 = vor.u32 %v1732_v17, %v1506_v18  ;;  %v1424_v22 = vld [vmem:[#allocation5 + $0x250] sm:$0xf]  ;;  %v1497_v28 = vor.u32 %v1731_v27, %v1496_v26  ;;  %v1730_v29 = vld [vmem:[#allocation5 + $0x2e4] sm:$0xf]  ;;  %v1416_v34 = vld [vmem:[#allocation5 + $0x240] sm:$0xf] }
  0x3f   :  { %551 = vmatpush.bf16.msrb.mxu2 %v1293_v16  ;;  %v1733_v16 = vld [vmem:[#allocation5 + $0x2f4] sm:$0xf0]  ;;  %v1728_v39 = vld [vmem:[#allocation5 + $0x2d4] sm:$0xf]  ;;  %v1710_v40 = vld [vmem:[#allocation5 + $0x244] sm:$0xf] }
  0x40   :  { %564 = vmatpush.bf16.msrb.mxu3 %v1357_v24  ;;  %v1505_v20 = vor.u32 %v1733_v16, %v1504_v14  ;;  %v1712_v24 = vld [vmem:[#allocation5 + $0x254] sm:$0xf]  ;;  %v1729_v38 = vld [vmem:[#allocation5 + $0x2d4] sm:$0xf0]  ;;  %v1490_v42 = vld [vmem:[#allocation5 + $0x2d8] sm:$0xf0] }
  0x41   :  { %526 = vmatpush.bf16.msrb.mxu0 %v1281_v23  ;;  %v1713_v23 = vld [vmem:[#allocation5 + $0x254] sm:$0xf0]  ;;  %v1493_v44 = vor.u32 %v1728_v39, %v1490_v42  ;;  %v1408_v48 = vld [vmem:[#allocation5 + $0x230] sm:$0xf]  ;;  %v1708_v50 = vld [vmem:[#allocation5 + $0x234] sm:$0xf] }
  0x42   :  { %539 = vmatpush.bf16.msrb.mxu1 %v1345_v35  ;;  %v1425_v32 = vor.u32 %v1713_v23, %v1424_v22  ;;  %v1711_v35 = vld [vmem:[#allocation5 + $0x244] sm:$0xf0]  ;;  %v1410_v51 = vld [vmem:[#allocation5 + $0x238] sm:$0xf0]  ;;  %v1480_v9 = vld [vmem:[#allocation5 + $0x2c0] sm:$0xf] }
  0x43   :  { %552 = vmatpush.bf16.msrb.mxu2 %v1285_v25  ;;  %v1426_v25 = vld [vmem:[#allocation5 + $0x258] sm:$0xf0]  ;;  %v1417_v45 = vor.u32 %v1711_v35, %v1416_v34  ;;  %v1413_v56 = vor.u32 %v1708_v50, %v1410_v51  ;;  %v1727_v10 = vld [vmem:[#allocation5 + $0x2c4] sm:$0xf0]  ;;  %v1482_v13 = vld [vmem:[#allocation5 + $0x2c8] sm:$0xf0] }
  0x44   :  { %565 = vmatpush.bf16.msrb.mxu3 %v1349_v37  ;;  %v1429_v36 = vor.u32 %v1712_v24, %v1426_v25  ;;  %v1488_v37 = vld [vmem:[#allocation5 + $0x2d0] sm:$0xf]  ;;  %v1481_v12 = vor.u32 %v1727_v10, %v1480_v9  ;;  %v1400_v14 = vld [vmem:[#allocation5 + $0x220] sm:$0xf]  ;;  %v1706_v18 = vld [vmem:[#allocation5 + $0x224] sm:$0xf] }
  0x45   :  { %527 = vmatpush.bf16.msrb.mxu0 %v1273_v30  ;;  %v1498_v30 = vld [vmem:[#allocation5 + $0x2e8] sm:$0xf0]  ;;  %v1725_v22 = vld [vmem:[#allocation5 + $0x2b4] sm:$0xf0]  ;;  %v1724_v23 = vld [vmem:[#allocation5 + $0x2b4] sm:$0xf] }
  0x46   :  { %540 = vmatpush.bf16.msrb.mxu1 %v1337_v47  ;;  %v1501_v33 = vor.u32 %v1730_v29, %v1498_v30  ;;  %v1474_v24 = vld [vmem:[#allocation5 + $0x2b8] sm:$0xf0]  ;;  %v1392_v27 = vld [vmem:[#allocation5 + $0x210] sm:$0xf]  ;;  %v1704_v29 = vld [vmem:[#allocation5 + $0x214] sm:$0xf] }
  0x47   :  { %553 = vmatpush.bf16.msrb.mxu2 %v1277_v31  ;;  %v96_v31 = vld [vmem:[#allocation7] sm:$0x3]  ;;  %v1477_v26 = vor.u32 %v1724_v23, %v1474_v24  ;;  %v1723_v34 = vld [vmem:[#allocation5 + $0x2a4] sm:$0xf0]  ;;  %v1722_v35 = vld [vmem:[#allocation5 + $0x2a4] sm:$0xf] }
  0x48   :  { %566 = vmatpush.bf16.msrb.mxu3 %v1341_v49  ;;  %v98_v46 = vperm.slane %v96_v31, 0  ;;  %v1709_v49 = vld [vmem:[#allocation5 + $0x234] sm:$0xf0]  ;;  %v99_v58 = vperm.slane %v96_v31, 1  ;;  %v1394_v31 = vld [vmem:[#allocation5 + $0x218] sm:$0xf0] }
  0x49   :  { %528 = vmatpush.bf16.msrb.mxu0 %v1265_v41  ;;  %v1418_v41 = vld [vmem:[#allocation5 + $0x248] sm:$0xf0]  ;;  %v1384_v39 = vld [vmem:[#allocation5 + $0x200] sm:$0xf]  ;;  %v1743_v23 = vld [vmem:[#allocation5 + $0x344] sm:$0xf0] }
  0x4a   :  { %541 = vmatpush.bf16.msrb.mxu1 %v1329_v59  ;;  %v1421_v47 = vor.u32 %v1710_v40, %v1418_v41  ;;  %v1703_v40 = vld [vmem:[#allocation5 + $0x204] sm:$0xf0]  ;;  %v1702_v41 = vld [vmem:[#allocation5 + $0x204] sm:$0xf]  ;;  %v1448_v51 = vld [vmem:[#allocation5 + $0x280] sm:$0xf] }
  0x4b   :  { %554 = vmatpush.bf16.msrb.mxu2 %v1269_v43  ;;  %v1489_v43 = vor.u32 %v1729_v38, %v1488_v37  ;;  %v1466_v37 = vld [vmem:[#allocation5 + $0x2a8] sm:$0xf0]  ;;  %v1385_v42 = vor.u32 %v1703_v40, %v1384_v39  ;;  %v1740_v40 = vld [vmem:[#allocation5 + $0x334] sm:$0xf]  ;;  %s1115_s5 = sshll.u32 %s1919_s3, 4  ;;  %s1116_s5 = int_to_ptr.hbm [resolvable:$true] %s1115_s5 }
  0x4c   :  { %567 = vmatpush.bf16.msrb.mxu3 %v1333_v61  ;;  %v1469_v38 = vor.u32 %v1722_v35, %v1466_v37  ;;  %v1536_v37 = vld [vmem:[#allocation5 + $0x330] sm:$0xf] }
  0x4d   :  { %529 = vmatpush.bf16.msrb.mxu0 %v1257_v53  ;;  %v1409_v53 = vor.u32 %v1709_v49, %v1408_v48  ;;  %v1458_v49 = vld [vmem:[#allocation5 + $0x298] sm:$0xf0] }
  0x4e   :  { %542 = vmatpush.bf16.msrb.mxu1 %v1321_v1 }
  0x4f   :  { %555 = vmatpush.bf16.msrb.mxu2 %v1261_v55 }
  0x50   :  { %568 = vmatpush.bf16.msrb.mxu3 %v1325_v3 }
  0x51   :  { %782 = vmatpush.bf16.msra.mxu0 %v1441_v7 }
  0x52   :  { %795 = vmatpush.bf16.msra.mxu1 %v1505_v20  ;;  %v1472_v20 = vld [vmem:[#allocation5 + $0x2b0] sm:$0xf] }
  0x53   :  { %808 = vmatpush.bf16.msra.mxu2 %v1445_v11  ;;  %v1726_v11 = vld [vmem:[#allocation5 + $0x2c4] sm:$0xf]  ;;  %v1473_v25 = vor.u32 %v1725_v22, %v1472_v20  ;;  %v1544_v22 = vld [vmem:[#allocation5 + $0x340] sm:$0xf] }
  0x54   :  { %821 = vmatpush.bf16.msra.mxu3 %v1509_v21  ;;  %v1485_v16 = vor.u32 %v1726_v11, %v1482_v13  ;;  %v1552_v11 = vld [vmem:[#allocation5 + $0x350] sm:$0xf]  ;;  %v1744_v13 = vld [vmem:[#allocation5 + $0x354] sm:$0xf]  ;;  %v1545_v35 = vor.u32 %v1743_v23, %v1544_v22  ;;  %v1592_v22 = vld [vmem:[#allocation5 + $0x3a0] sm:$0xf] }
  0x55   :  { %783 = vmatpush.bf16.msra.mxu0 %v1433_v15  ;;  %v1707_v15 = vld [vmem:[#allocation5 + $0x224] sm:$0xf0] }
  0x56   :  { %796 = vmatpush.bf16.msra.mxu1 %v1497_v28  ;;  %v1401_v17 = vor.u32 %v1707_v15, %v1400_v14  ;;  %v1705_v28 = vld [vmem:[#allocation5 + $0x214] sm:$0xf0]  ;;  %v1554_v14 = vld [vmem:[#allocation5 + $0x358] sm:$0xf0]  ;;  %v1624_v15 = vld [vmem:[#allocation5 + $0x3e0] sm:$0xf] }
  0x57   :  { %809 = vmatpush.bf16.msra.mxu2 %v1437_v19  ;;  %v1402_v19 = vld [vmem:[#allocation5 + $0x228] sm:$0xf0]  ;;  %v1393_v30 = vor.u32 %v1705_v28, %v1392_v27  ;;  %v1557_v24 = vor.u32 %v1744_v13, %v1554_v14  ;;  %v1760_v27 = vld [vmem:[#allocation5 + $0x3d4] sm:$0xf]  ;;  %v1742_v28 = vld [vmem:[#allocation5 + $0x344] sm:$0xf] }
  0x58   :  { %822 = vmatpush.bf16.msra.mxu3 %v1501_v33  ;;  %v1405_v21 = vor.u32 %v1706_v18, %v1402_v19  ;;  %v1464_v33 = vld [vmem:[#allocation5 + $0x2a0] sm:$0xf]  ;;  %v1762_v18 = vld [vmem:[#allocation5 + $0x3e4] sm:$0xf]  ;;  %v1626_v19 = vld [vmem:[#allocation5 + $0x3e8] sm:$0xf0] }
  0x59   :  { %784 = vmatpush.bf16.msra.mxu0 %v1425_v32  ;;  %v1397_v32 = vor.u32 %v1704_v29, %v1394_v31  ;;  %v1546_v29 = vld [vmem:[#allocation5 + $0x348] sm:$0xf0]  ;;  %v356_v31 = vld [vmem:[#allocation7 + $0x2] sm:$0x3]  ;;  %v1756_v13 = vld [vmem:[#allocation5 + $0x3b4] sm:$0xf] }
  0x5a   :  { %797 = vmatpush.bf16.msra.mxu1 %v1489_v43  ;;  %v1386_v43 = vld [vmem:[#allocation5 + $0x208] sm:$0xf0]  ;;  %v358_v39 = vperm.slane %v356_v31, 0  ;;  %v1602_v14 = vld [vmem:[#allocation5 + $0x3b8] sm:$0xf0] }
  0x5b   :  { %810 = vmatpush.bf16.msra.mxu2 %v1429_v36  ;;  %v1465_v36 = vor.u32 %v1723_v34, %v1464_v33  ;;  %v1755_v23 = vld [vmem:[#allocation5 + $0x3a4] sm:$0xf0] }
  0x5c   :  { %823 = vmatpush.bf16.msra.mxu3 %v1493_v44  ;;  %v1389_v44 = vor.u32 %v1702_v41, %v1386_v43  ;;  %v1538_v41 = vld [vmem:[#allocation5 + $0x338] sm:$0xf0] }
  0x5d   :  { %785 = vmatpush.bf16.msra.mxu0 %v1417_v45  ;;  %v1456_v45 = vld [vmem:[#allocation5 + $0x290] sm:$0xf]  ;;  %v1541_v43 = vor.u32 %v1740_v40, %v1538_v41  ;;  %v1576_v40 = vld [vmem:[#allocation5 + $0x380] sm:$0xf]  ;;  %v1751_v41 = vld [vmem:[#allocation5 + $0x384] sm:$0xf0] }
  0x5e   :  { %798 = vmatpush.bf16.msra.mxu1 %v1481_v12  ;;  %v1745_v12 = vld [vmem:[#allocation5 + $0x354] sm:$0xf0] }
  0x5f   :  { %811 = vmatpush.bf16.msra.mxu2 %v1421_v47  ;;  %v1720_v47 = vld [vmem:[#allocation5 + $0x294] sm:$0xf]  ;;  %v1553_v20 = vor.u32 %v1745_v12, %v1552_v11 }
  0x60   :  { %824 = vmatpush.bf16.msra.mxu3 %v1485_v16  ;;  %v1461_v50 = vor.u32 %v1720_v47, %v1458_v49  ;;  %v1763_v16 = vld [vmem:[#allocation5 + $0x3e4] sm:$0xf0] }
  0x61   :  { %786 = vmatpush.bf16.msra.mxu0 %v1409_v53  ;;  %v1718_v53 = vld [vmem:[#allocation5 + $0x284] sm:$0xf] }
  0x62   :  { %799 = vmatpush.bf16.msra.mxu1 %v1473_v25  ;;  %v1616_v25 = vld [vmem:[#allocation5 + $0x3d0] sm:$0xf] }
  0x63   :  { %812 = vmatpush.bf16.msra.mxu2 %v1413_v56 }
  0x64   :  { %825 = vmatpush.bf16.msra.mxu3 %v1477_v26  ;;  %v1761_v26 = vld [vmem:[#allocation5 + $0x3d4] sm:$0xf0] }
  0x65   :  { %787 = vmatpush.bf16.msra.mxu0 %v1401_v17  ;;  %v1625_v17 = vor.u32 %v1763_v16, %v1624_v15  ;;  %v1605_v15 = vor.u32 %v1756_v13, %v1602_v14  ;;  %v1520_v16 = vld [vmem:[#allocation5 + $0x310] sm:$0xf] }
  0x66   :  { %800 = vmatpush.bf16.msra.mxu1 %v1465_v36  ;;  %v1549_v36 = vor.u32 %v1742_v28, %v1546_v29  ;;  %v1512_v28 = vld [vmem:[#allocation5 + $0x300] sm:$0xf]  ;;  %v1735_v29 = vld [vmem:[#allocation5 + $0x304] sm:$0xf0] }
  0x67   :  { %813 = vmatpush.bf16.msra.mxu2 %v1405_v21  ;;  %v1629_v21 = vor.u32 %v1762_v18, %v1626_v19  ;;  %v1736_v18 = vld [vmem:[#allocation5 + $0x314] sm:$0xf] }
  0x68   :  { %826 = vmatpush.bf16.msra.mxu3 %v1469_v38  ;;  %v1741_v38 = vld [vmem:[#allocation5 + $0x334] sm:$0xf0] }
  0x69   :  { %788 = vmatpush.bf16.msra.mxu0 %v1393_v30  ;;  %v1618_v30 = vld [vmem:[#allocation5 + $0x3d8] sm:$0xf0] }
  0x6a   :  { %v1621_v33 = vor.u32 %v1760_v27, %v1618_v30  ;;  %v1734_v30 = vld [vmem:[#allocation5 + $0x304] sm:$0xf] }
  0x6b   :  { %814 = vmatpush.bf16.msra.mxu2 %v1397_v32  ;;  %v1617_v32 = vor.u32 %v1761_v26, %v1616_v25  ;;  %v1593_v25 = vor.u32 %v1755_v23, %v1592_v22  ;;  %v1594_v26 = vld [vmem:[#allocation5 + $0x3a8] sm:$0xf0] }
  0x6c   :  { %827 = vmatpush.bf16.msra.mxu3 %v1461_v50 }
  0x6d   :  { %789 = vmatpush.bf16.msra.mxu0 %v1385_v42  ;;  %v1537_v42 = vor.u32 %v1741_v38, %v1536_v37  ;;  %v1586_v38 = vld [vmem:[#allocation5 + $0x398] sm:$0xf0] }
  0x6f   :  { %815 = vmatpush.bf16.msra.mxu2 %v1389_v44 }
  0xad   :  { %v271_v52 = vpop.f32.mrf.mxu0 }
  0xae   :  { %v272_v54 = vadd.f32 %v271_v52, %v98_v46  ;;  %v284_v55 = vpop.f32.mrf.mxu1  ;;  %v1721_v46 = vld [vmem:[#allocation5 + $0x294] sm:$0xf0]  ;;  %v1719_v52 = vld [vmem:[#allocation5 + $0x284] sm:$0xf0] }
  0xaf   :  { %v1457_v48 = vor.u32 %v1721_v46, %v1456_v45 }
  0xb0   :  { %v285_v57 = vadd.f32 %v284_v55, %v272_v54  ;;  %v1449_v54 = vor.u32 %v1719_v52, %v1448_v51  ;;  %v1450_v55 = vld [vmem:[#allocation5 + $0x288] sm:$0xf0] }
  0xb1   :  { %801 = vmatpush.bf16.msra.mxu1 %v1457_v48  ;;  %v1453_v56 = vor.u32 %v1718_v53, %v1450_v55  ;;  %v359_v48 = vperm.slane %v356_v31, 1  ;;  %v1513_v31 = vor.u32 %v1735_v29, %v1512_v28 }
  0xb2   :  { %vm314_vm0 = vcmp.gt.f32.partialorder %v285_v57, 0.0  ;;  %v316_v59 = vmul.f32 0.01, %v285_v57 }
  0xb3   :  { %828 = vmatpush.bf16.msra.mxu3 %v1453_v56 }
  0xb4   :  { %v318_v61 = vsel %vm314_vm0, %v285_v57, %v316_v59  ;;  %v1568_v57 = vld [vmem:[#allocation5 + $0x370] sm:$0xf]  ;;  %v1748_v59 = vld [vmem:[#allocation5 + $0x374] sm:$0xf] }
  0xb5   :  { %v297_v60 = vpop.f32.mrf.mxu2  ;;  %v273_v0 = vpop.f32.mrf.mxu0  ;;  %v320_v1 = vpack.c.bf16 %v318_v61, %v318_v61  ;;  %802 = vmatpush.bf16.msra.mxu1 %v1449_v54  ;;  %v1570_v61 = vld [vmem:[#allocation5 + $0x378] sm:$0xf0] }
  0xb6   :  { %v298_v62 = vadd.f32 %v297_v60, %v99_v58  ;;  %v310_v63 = vpop.f32.mrf.mxu3  ;;  %v286_v2 = vpop.f32.mrf.mxu1  ;;  %v1749_v58 = vld [vmem:[#allocation5 + $0x374] sm:$0xf0]  ;;  %v1573_v0 = vor.u32 %v1748_v59, %v1570_v61 }
  0xb7   :  { %530 = vmatmul.bf16.vlgmr.msrb.gmra.mxu0 %v320_v1  ;;  %556 = vmatmul.bf16.vlgmr.msrb.gmra.mxu2 %v320_v1  ;;  %v1569_v60 = vor.u32 %v1749_v58, %v1568_v57  ;;  %v1746_v1 = vld [vmem:[#allocation5 + $0x364] sm:$0xf]  ;;  %v1562_v2 = vld [vmem:[#allocation5 + $0x368] sm:$0xf0] }
  0xb8   :  { %v311_v3 = vadd.f32 %v310_v63, %v298_v62  ;;  %v1560_v62 = vld [vmem:[#allocation5 + $0x360] sm:$0xf]  ;;  %v1747_v63 = vld [vmem:[#allocation5 + $0x364] sm:$0xf0]  ;;  %1068 = vmatpush.bf16.msrb.mxu2 %v1573_v0  ;;  %v1758_v0 = vld [vmem:[#allocation5 + $0x3c4] sm:$0xf] }
  0xb9   :  { %1042 = vmatpush.bf16.msrb.mxu0 %v1569_v60 }
  0xba   :  { %vm315_vm1 = vcmp.gt.f32.partialorder %v311_v3, 0.0  ;;  %v317_v4 = vmul.f32 0.01, %v311_v3 }
  0xbc   :  { %v319_v5 = vsel %vm315_vm1, %v311_v3, %v317_v4  ;;  %v1632_v3 = vld [vmem:[#allocation5 + $0x3f0] sm:$0xf]  ;;  %v1561_v4 = vor.u32 %v1747_v63, %v1560_v62  ;;  %v1608_v62 = vld [vmem:[#allocation5 + $0x3c0] sm:$0xf]  ;;  %v1759_v63 = vld [vmem:[#allocation5 + $0x3c4] sm:$0xf0] }
  0xbd   :  { %v299_v6 = vpop.f32.mrf.mxu2  ;;  %v321_v7 = vpack.c.bf16 %v319_v5, %v319_v5  ;;  %v1765_v5 = vld [vmem:[#allocation5 + $0x3f4] sm:$0xf0] }
  0xbe   :  { %v312_v8 = vpop.f32.mrf.mxu3  ;;  %v1764_v6 = vld [vmem:[#allocation5 + $0x3f4] sm:$0xf]  ;;  %v1633_v9 = vor.u32 %v1765_v5, %v1632_v3  ;;  %1043 = vmatpush.bf16.msrb.mxu0 %v1561_v4  ;;  %v1528_v4 = vld [vmem:[#allocation5 + $0x320] sm:$0xf]  ;;  %v1739_v5 = vld [vmem:[#allocation5 + $0x324] sm:$0xf0] }
  0xbf   :  { %543 = vmatmul.bf16.vlgmr.msrb.gmra.mxu1 %v321_v7  ;;  %569 = vmatmul.bf16.vlgmr.msrb.gmra.mxu3 %v321_v7  ;;  %v1634_v7 = vld [vmem:[#allocation5 + $0x3f8] sm:$0xf0]  ;;  %v1565_v8 = vor.u32 %v1746_v1, %v1562_v2  ;;  %v1609_v1 = vor.u32 %v1759_v63, %v1608_v62  ;;  %v1610_v2 = vld [vmem:[#allocation5 + $0x3c8] sm:$0xf0] }
  0xc0   :  { %v1637_v10 = vor.u32 %v1764_v6, %v1634_v7  ;;  %1055 = vmatpush.bf16.msrb.mxu1 %v1633_v9  ;;  %v1613_v3 = vor.u32 %v1758_v0, %v1610_v2  ;;  %v1738_v6 = vld [vmem:[#allocation5 + $0x324] sm:$0xf]  ;;  %v1529_v7 = vor.u32 %v1739_v5, %v1528_v4  ;;  %v1600_v9 = vld [vmem:[#allocation5 + $0x3b0] sm:$0xf] }
  0xc1   :  { %1069 = vmatpush.bf16.msrb.mxu2 %v1565_v8  ;;  %v1530_v8 = vld [vmem:[#allocation5 + $0x328] sm:$0xf0] }
  0xc2   :  { %1081 = vmatpush.bf16.msrb.mxu3 %v1637_v10  ;;  %1044 = vmatpush.bf16.msrb.mxu0 %v1553_v20  ;;  %v1757_v10 = vld [vmem:[#allocation5 + $0x3b4] sm:$0xf0]  ;;  %v1533_v11 = vor.u32 %v1738_v6, %v1530_v8  ;;  %v1522_v20 = vld [vmem:[#allocation5 + $0x318] sm:$0xf0] }
  0xc3   :  { %v1601_v12 = vor.u32 %v1757_v10, %v1600_v9 }
  0xc4   :  { %1056 = vmatpush.bf16.msrb.mxu1 %v1625_v17  ;;  %v1737_v17 = vld [vmem:[#allocation5 + $0x314] sm:$0xf0] }
  0xc5   :  { %1070 = vmatpush.bf16.msrb.mxu2 %v1557_v24  ;;  %v1521_v19 = vor.u32 %v1737_v17, %v1520_v16  ;;  %v1754_v24 = vld [vmem:[#allocation5 + $0x3a4] sm:$0xf] }
  0xc6   :  { %1082 = vmatpush.bf16.msrb.mxu3 %v1629_v21  ;;  %1045 = vmatpush.bf16.msrb.mxu0 %v1545_v35  ;;  %v1525_v21 = vor.u32 %v1736_v18, %v1522_v20  ;;  %v1597_v27 = vor.u32 %v1754_v24, %v1594_v26  ;;  %v1753_v35 = vld [vmem:[#allocation5 + $0x394] sm:$0xf0] }
  0xc8   :  { %1057 = vmatpush.bf16.msrb.mxu1 %v1617_v32  ;;  %v1514_v32 = vld [vmem:[#allocation5 + $0x308] sm:$0xf0] }
  0xc9   :  { %1071 = vmatpush.bf16.msrb.mxu2 %v1549_v36  ;;  %v1752_v36 = vld [vmem:[#allocation5 + $0x394] sm:$0xf] }
  0xca   :  { %1083 = vmatpush.bf16.msrb.mxu3 %v1621_v33  ;;  %1046 = vmatpush.bf16.msrb.mxu0 %v1537_v42  ;;  %v1517_v33 = vor.u32 %v1734_v30, %v1514_v32  ;;  %v1750_v42 = vld [vmem:[#allocation5 + $0x384] sm:$0xf] }
  0xcc   :  { %1058 = vmatpush.bf16.msrb.mxu1 %v1609_v1 }
  0xcd   :  { %1072 = vmatpush.bf16.msrb.mxu2 %v1541_v43  ;;  %v1577_v43 = vor.u32 %v1751_v41, %v1576_v40 }
  0xce   :  { %1084 = vmatpush.bf16.msrb.mxu3 %v1613_v3  ;;  %1047 = vmatpush.bf16.msrb.mxu0 %v1529_v7  ;;  %v876_v3 = vld [vmem:[#allocation7 + $0x6] sm:$0x3] }
  0xcf   :  { %v878_v5 = vperm.slane %v876_v3, 0  ;;  %v879_v10 = vperm.slane %v876_v3, 1 }
  0xd0   :  { %1059 = vmatpush.bf16.msrb.mxu1 %v1601_v12 }
  0xd1   :  { %1073 = vmatpush.bf16.msrb.mxu2 %v1533_v11 }
  0xd2   :  { %1085 = vmatpush.bf16.msrb.mxu3 %v1605_v15  ;;  %1048 = vmatpush.bf16.msrb.mxu0 %v1521_v19 }
  0xd4   :  { %1060 = vmatpush.bf16.msrb.mxu1 %v1593_v25 }
  0xd5   :  { %1074 = vmatpush.bf16.msrb.mxu2 %v1525_v21 }
  0xd6   :  { %1086 = vmatpush.bf16.msrb.mxu3 %v1597_v27  ;;  %1049 = vmatpush.bf16.msrb.mxu0 %v1513_v31 }
  0xd9   :  { %1075 = vmatpush.bf16.msrb.mxu2 %v1517_v33 }
 0x134   :  { %v531_v34 = vpop.f32.mrf.mxu0 }
 0x135   :  { %v532_v44 = vadd.f32 %v531_v34, %v358_v39  ;;  %v1584_v34 = vld [vmem:[#allocation5 + $0x390] sm:$0xf]  ;;  %v1589_v39 = vor.u32 %v1752_v36, %v1586_v38 }
 0x136   :  { %v1585_v37 = vor.u32 %v1753_v35, %v1584_v34 }
 0x137   :  { %1087 = vmatpush.bf16.msrb.mxu3 %v1589_v39 }
 0x138   :  { %1061 = vmatpush.bf16.msrb.mxu1 %v1585_v37 }
 0x13a   :  { %v557_v45 = vpop.f32.mrf.mxu2 }
 0x13b   :  { %v558_v52 = vadd.f32 %v557_v45, %v359_v48 }
 0x13c   :  { %v544_v46 = vpop.f32.mrf.mxu1  ;;  %v533_v49 = vpop.f32.mrf.mxu0  ;;  %1062 = vmatpush.bf16.msrb.mxu1 %v1577_v43 }
 0x13d   :  { %v545_v47 = vadd.f32 %v544_v46, %v532_v44  ;;  %v1578_v44 = vld [vmem:[#allocation5 + $0x388] sm:$0xf0]  ;;  %v616_v46 = vld [vmem:[#allocation7 + $0x4] sm:$0x3] }
 0x13e   :  { %v1581_v45 = vor.u32 %v1750_v42, %v1578_v44  ;;  %v618_v48 = vperm.slane %v616_v46, 0 }
 0x13f   :  { %vm574_vm2 = vcmp.gt.f32.partialorder %v545_v47, 0.0  ;;  %v576_v50 = vmul.f32 0.01, %v545_v47 }
 0x140   :  { %1088 = vmatpush.bf16.msrb.mxu3 %v1581_v45 }
 0x141   :  { %v578_v51 = vsel %vm574_vm2, %v545_v47, %v576_v50 }
 0x142   :  { %v580_v53 = vpack.c.bf16 %v578_v51, %v578_v51  ;;  %v570_v54 = vpop.f32.mrf.mxu3  ;;  %v559_v56 = vpop.f32.mrf.mxu2 }
 0x143   :  { %v571_v55 = vadd.f32 %v570_v54, %v558_v52 }
 0x144   :  { %v546_v57 = vpop.f32.mrf.mxu1  ;;  %790 = vmatmul.bf16.vlgmr.msra.gmra.mxu0 %v580_v53  ;;  %816 = vmatmul.bf16.vlgmr.msra.gmra.mxu2 %v580_v53  ;;  %v619_v53 = vperm.slane %v616_v46, 1 }
 0x145   :  { %vm575_vm3 = vcmp.gt.f32.partialorder %v571_v55, 0.0  ;;  %v577_v58 = vmul.f32 0.01, %v571_v55 }
 0x147   :  { %v579_v59 = vsel %vm575_vm3, %v571_v55, %v577_v58 }
 0x148   :  { %v581_v60 = vpack.c.bf16 %v579_v59, %v579_v59 }
 0x14a   :  { %v572_v61 = vpop.f32.mrf.mxu3  ;;  %803 = vmatmul.bf16.vlgmr.msra.gmra.mxu1 %v581_v60  ;;  %829 = vmatmul.bf16.vlgmr.msra.gmra.mxu3 %v581_v60 }
 0x1c1   :  { %v791_v47 = vpop.f32.mrf.mxu0 }
 0x1c2   :  { %v792_v49 = vadd.f32 %v791_v47, %v618_v48 }
 0x1c7   :  { %v804_v50 = vpop.f32.mrf.mxu1  ;;  %v817_v51 = vpop.f32.mrf.mxu2 }
 0x1c8   :  { %v805_v52 = vadd.f32 %v804_v50, %v792_v49  ;;  %v818_v57 = vadd.f32 %v817_v51, %v619_v53 }
 0x1c9   :  { %v793_v54 = vpop.f32.mrf.mxu0 }
 0x1ca   :  { %vm834_vm4 = vcmp.gt.f32.partialorder %v805_v52, 0.0  ;;  %v836_v55 = vmul.f32 0.01, %v805_v52 }
 0x1cc   :  { %v838_v56 = vsel %vm834_vm4, %v805_v52, %v836_v55 }
 0x1cd   :  { %v840_v58 = vpack.c.bf16 %v838_v56, %v838_v56  ;;  %v830_v59 = vpop.f32.mrf.mxu3 }
 0x1ce   :  { %v831_v60 = vadd.f32 %v830_v59, %v818_v57 }
 0x1cf   :  { %v806_v61 = vpop.f32.mrf.mxu1  ;;  %v819_v62 = vpop.f32.mrf.mxu2  ;;  %1050 = vmatmul.bf16.vlgmr.msrb.gmra.mxu0 %v840_v58  ;;  %1076 = vmatmul.bf16.vlgmr.msrb.gmra.mxu2 %v840_v58 }
 0x1d0   :  { %vm835_vm5 = vcmp.gt.f32.partialorder %v831_v60, 0.0  ;;  %v837_v63 = vmul.f32 0.01, %v831_v60 }
 0x1d2   :  { %v839_v0 = vsel %vm835_vm5, %v831_v60, %v837_v63 }
 0x1d3   :  { %v841_v1 = vpack.c.bf16 %v839_v0, %v839_v0 }
 0x1d5   :  { %v832_v2 = vpop.f32.mrf.mxu3  ;;  %1063 = vmatmul.bf16.vlgmr.msrb.gmra.mxu1 %v841_v1  ;;  %1089 = vmatmul.bf16.vlgmr.msrb.gmra.mxu3 %v841_v1 }
 0x24c   :  { %v1051_v4 = vpop.f32.mrf.mxu0 }
 0x24d   :  { %v1052_v6 = vadd.f32 %v1051_v4, %v878_v5 }
 0x252   :  { %v1064_v7 = vpop.f32.mrf.mxu1  ;;  %v1077_v8 = vpop.f32.mrf.mxu2 }
 0x253   :  { %v1065_v9 = vadd.f32 %v1064_v7, %v1052_v6  ;;  %v1078_v14 = vadd.f32 %v1077_v8, %v879_v10 }
 0x254   :  { %v1053_v11 = vpop.f32.mrf.mxu0 }
 0x255   :  { %vm1094_vm6 = vcmp.gt.f32.partialorder %v1065_v9, 0.0  ;;  %v1096_v12 = vmul.f32 0.01, %v1065_v9 }
 0x257   :  { %v1098_v13 = vsel %vm1094_vm6, %v1065_v9, %v1096_v12 }
 0x258   :  { %vm1100_vm7 = vcmp.gt.f32.partialorder %v1098_v13, 0.0  ;;  %v1102_v15 = vmul.f32 0.01, %v1098_v13  ;;  %v1090_v16 = vpop.f32.mrf.mxu3 }
 0x259   :  { %v1091_v17 = vadd.f32 %v1090_v16, %v1078_v14 }
 0x25a   :  { %v1066_v18 = vpop.f32.mrf.mxu1  ;;  %v1079_v19 = vpop.f32.mrf.mxu2  ;;  %v1104_v20 = vsel %vm1100_vm7, %v1098_v13, %v1102_v15 }
 0x25b   :  { %vm1095_vm8 = vcmp.gt.f32.partialorder %v1091_v17, 0.0  ;;  %v1097_v21 = vmul.f32 0.01, %v1091_v17  ;;  %1106 = vst [vmem:[#allocation8] sm:$0xff] %v1104_v20 }
 0x25d   :  { %v1099_v22 = vsel %vm1095_vm8, %v1091_v17, %v1097_v21 }
 0x25e   :  { %vm1101_vm9 = vcmp.gt.f32.partialorder %v1099_v22, 0.0  ;;  %v1103_v23 = vmul.f32 0.01, %v1099_v22 }
 0x260   :  { %v1092_v24 = vpop.f32.mrf.mxu3  ;;  %v1105_v25 = vsel %vm1101_vm9, %v1099_v22, %v1103_v23 }
 0x261   :  { %1107 = vst [vmem:[#allocation8 + $0x8] sm:$0xff] %v1105_v25 }
 0x262   :  { %1118 = dma.vmem_to_hbm [thread:$0]  %s1114_s2, 256, %s1116_s5, [#allocation4]  }
 0x263   :  { %1874 = dma.done.wait [#allocation4], 256  }
 0x264   :  { %1875 = vsyncadd [#allocation4], 4294967040 }
 0x265   :  { %1123 = vsyncpa [#allocation3], 1 }
 0x266   :  { %1124 = vsyncpa [#allocation6], 1 }
 0x267   :  { %1125 = vsyncpa [#allocation4], 1 }

</bundles_post_ra>
